<compile_context>
chip_gen: v7x
topology: tpu7x:2x2x1
jax: 0.10.0
libtpu: 0.0.40
codegen_flags: <defaults>
</compile_context>

<pallas_src>
import functools

import numpy as np
import jax
import jax.numpy as jnp
from jax.experimental import pallas as pl
from jax.experimental.pallas import tpu as pltpu


# Work-queue table layout (int32[6, num_work], one column per work item):
#   [0] image index n
#   [1] H-tile (block) index within that image
#   [2] row_start   first erased row      (upper_left_x in the reference)
#   [3] row_end     row_start + hh
#   [4] col_start   first erased column   (upper_left_y in the reference)
#   [5] col_end     col_start + ww
_N_FIELDS = 6


def _erase_kernel(work_ref, x_ref, o_ref, *, row_tile):
    w = pl.program_id(0)                      # work-queue position
    row0 = work_ref[1, w] * row_tile          # absolute row of sublane 0
    rs = work_ref[2, w]
    re = work_ref[3, w]
    cs = work_ref[4, w]
    ce = work_ref[5, w]

    x = x_ref[...]                            # (1, C, TH, W)
    th, width = x.shape[2], x.shape[3]
    rows = row0 + jax.lax.broadcasted_iota(jnp.int32, (1, 1, th, 1), 2)
    cols = jax.lax.broadcasted_iota(jnp.int32, (1, 1, 1, width), 3)
    row_in = (rows >= rs) & (rows < re)       # (1, 1, TH, 1)
    col_in = (cols >= cs) & (cols < ce)       # (1, 1, 1, W)
    in_rect = row_in & col_in                 # (1, 1, TH, W), channel-shared
    o_ref[...] = jnp.where(in_rect, jnp.zeros((), x.dtype), x)


def _sublane_multiple(itemsize):
    """Rows per packed sublane tile for this dtype width."""
    return {4: 8, 2: 16, 1: 32}.get(int(itemsize), 8)


def _choose_row_tile(C, H, W, itemsize, budget_bytes=12 * 1024 * 1024):
    """Rows per block so (in+out) double-buffered blocks fit default VMEM."""
    sub = _sublane_multiple(itemsize)
    per_row = 4 * C * W * itemsize            # 2 in-bufs + 2 out-bufs per row
    max_rows = min(max(sub, budget_bytes // per_row), 1024)
    if H <= max_rows:
        return H                              # full dim: always layout-legal
    cap = (max_rows // sub) * sub
    for th in range(cap, sub - 1, -sub):      # prefer a tile that divides H
        if H % th == 0:
            return th
    return cap                                # ragged edge tile (masked by Pallas)


def _build_work_queue(params5, H, row_tile):
    """Compact int32[6, num_work_padded] table of (image, H-tile) work items.

    params5: int32[N, 5] rows [apply_flag, row_start, hh, col_start, ww].
    Returns None when no image has an accepted, non-degenerate rectangle.
    """
    params5 = np.asarray(params5, dtype=np.int64)
    n_tiles = -(-H // row_tile)
    items = []
    for n in range(params5.shape[0]):
        flag, rs, hh, cs, ww = (int(v) for v in params5[n])
        if flag == 0 or hh <= 0 or ww <= 0:
            continue                          # rejected / degenerate: no work
        t0 = rs // row_tile
        t1 = min((rs + hh - 1) // row_tile, n_tiles - 1)
        for t in range(t0, t1 + 1):
            items.append((n, t, rs, rs + hh, cs, cs + ww))
    if not items:
        return None
    work = np.asarray(items, dtype=np.int32).T          # [6, num_work]
    num = work.shape[1]
    padded = 1 << (num - 1).bit_length()                 # next power of two
    if padded > num:
        # Pad with duplicates of the last item: the erase is idempotent and
        # elementwise, so re-applying it to the same tile is byte-identical.
        pad = np.repeat(work[:, -1:], padded - num, axis=1)
        work = np.concatenate([work, pad], axis=1)
    return np.ascontiguousarray(work, dtype=np.int32)


@functools.partial(jax.jit, static_argnames=("row_tile",), donate_argnums=(0,))
def _pallas_random_erase(images, work, *, row_tile):
    """In-place random-erase of a batch of images.

    images: (N, C, H, W) - the buffer is donated and updated in place (the
            output aliases it); only the (image, H-tile) pairs listed in the
            work queue move through VMEM, everything else keeps its original
            HBM contents.
    work:   int32[6, num_work] work-queue table, scalar-prefetched into SMEM.
    """
    N, C, H, W = images.shape
    num_work = work.shape[1]
    block = (1, C, row_tile, W)

    def index_map(w, work_ref):
        return (work_ref[0, w], 0, work_ref[1, w], 0)

    return pl.pallas_call(
        functools.partial(_erase_kernel, row_tile=row_tile),
        out_shape=jax.ShapeDtypeStruct((N, C, H, W), images.dtype),
        grid_spec=pltpu.PrefetchScalarGridSpec(
            num_scalar_prefetch=1,
            grid=(num_work,),
            in_specs=[pl.BlockSpec(block, index_map)],
            out_specs=pl.BlockSpec(block, index_map),
        ),
        # Output aliases the image input (index 1 counts the scalar-prefetch
        # operand): unvisited tiles keep their original HBM contents.
        input_output_aliases={1: 0},
        compiler_params=pltpu.CompilerParams(
            # Work items write disjoint tiles (padding duplicates are
            # byte-identical), so the flat queue can feed both v7x cores.
            dimension_semantics=("parallel",),
        ),
    )(work, images)


class RandomErase:
    """JAX/Pallas port of the PyTorch RandomErase module (forward only).

    NOTE: the erase is performed in place; the (batched) image buffer handed
    to the kernel is donated.  Callers that need the original afterwards must
    keep their own copy.
    """

    def __init__(self, icoef_h_offset, icoef_w_offset, scale_bounds,
                 log_ratio_bounds, random_seed=0):
        self.icoef_h_offset = icoef_h_offset
        self.icoef_w_offset = icoef_w_offset
        self.scale_bounds = scale_bounds
        self.log_ratio_bounds = log_ratio_bounds
        self.seed(random_seed)

    def seed(self, random_seed):
        self.rng = np.random.default_rng(random_seed)

    def _sample_params(self, height, width):
        """One rectangle; identical sampling order to the PyTorch module."""
        erase_h_offset = height // self.icoef_h_offset
        erase_w_offset = width // self.icoef_w_offset
        center_y = int(self.rng.integers(erase_h_offset, height - erase_h_offset,
                                         size=(1,))[0])
        center_x = int(self.rng.integers(erase_w_offset, width - erase_w_offset,
                                         size=(1,))[0])
        scale = float(self.rng.uniform(self.scale_bounds[0], self.scale_bounds[1],
                                       size=(1,))[0])
        log_ratio = float(self.rng.uniform(self.log_ratio_bounds[0],
                                           self.log_ratio_bounds[1], size=(1,))[0])

        # erase() geometry.  NOTE: center_x indexes ROWS and center_y indexes
        # COLUMNS -- this mirrors the reference implementation exactly.
        area = height * width
        center_x = int(round(center_x))
        center_y = int(round(center_y))
        erase_area = area * scale
        aspect_ratio = np.exp(log_ratio)
        hh = int(round((erase_area * aspect_ratio) ** 0.5))
        ww = int(round((erase_area / aspect_ratio) ** 0.5))
        upper_left_x = max(0, center_x - hh // 2)   # first erased row
        upper_left_y = max(0, center_y - ww // 2)   # first erased column
        if upper_left_x + hh < height and upper_left_y + ww < width:
            return np.array([1, upper_left_x, hh, upper_left_y, ww],
                            dtype=np.int32)
        return np.zeros((5,), dtype=np.int32)       # rejected: no-op

    def __call__(self, image):
        """image: (C, H, W) or batched (N, C, H, W)."""
        image = jnp.asarray(image)
        squeeze = image.ndim == 3
        images = image[None] if squeeze else image
        N, C, H, W = images.shape

        params5 = np.stack([self._sample_params(H, W) for _ in range(N)])
        row_tile = _choose_row_tile(C, H, W, images.dtype.itemsize)
        work = _build_work_queue(params5, H, row_tile)
        if work is None:
            out = images            # every rectangle rejected: true no-op
        else:
            out = _pallas_random_erase(images, jnp.asarray(work),
                                       row_tile=row_tile)
        return out[0] if squeeze else out


def _numpy_reference(images_np, params_np):
    out = np.array(images_np, copy=True)
    for n in range(out.shape[0]):
        apply_flag, rs, hh, cs, ww = (int(v) for v in params_np[n][:5])
        if apply_flag:
            out[n, :, rs:rs + hh, cs:cs + ww] = 0.0
    return out


if __name__ == "__main__":
    N, C, H, W = 2, 4, 16, 16
    row_tile = 8   # force two H-tiles per image so the "unvisited tiles keep
                   # their HBM contents" aliasing property is really exercised

    # 1) Forced rectangles: image 0 erased only inside H-tile 1 (rows 9..13),
    #    image 1 rejected (never enters the work queue).
    forced5 = np.array([[1, 9, 5, 2, 9],
                        [0, 0, 0, 0, 0]], dtype=np.int32)
    images = jax.random.normal(jax.random.PRNGKey(0), (N, C, H, W), jnp.float32)
    images_np = np.asarray(images)          # snapshot (buffer is donated below)
    work = _build_work_queue(forced5, H, row_tile)
    out = jax.block_until_ready(
        _pallas_random_erase(images, jnp.asarray(work), row_tile=row_tile))
    out_np = np.asarray(out)
    np.testing.assert_allclose(out_np, _numpy_reference(images_np, forced5),
                               rtol=0, atol=0)
    # Explicit checks that untouched tiles kept their original contents.
    np.testing.assert_array_equal(out_np[0, :, :8, :], images_np[0, :, :8, :])
    np.testing.assert_array_equal(out_np[1], images_np[1])

    # 2) Rectangle spanning both H-tiles of image 1 (exercises multi-tile
    #    bands and the power-of-two padding duplicates), plus one in image 0.
    forced5b = np.array([[1, 2, 4, 1, 6],
                         [1, 5, 8, 3, 7]], dtype=np.int32)
    images2 = jax.random.normal(jax.random.PRNGKey(1), (N, C, H, W), jnp.float32)
    images2_np = np.asarray(images2)
    work2 = _build_work_queue(forced5b, H, row_tile)
    out2 = jax.block_until_ready(
        _pallas_random_erase(images2, jnp.asarray(work2), row_tile=row_tile))
    np.testing.assert_allclose(np.asarray(out2),
                               _numpy_reference(images2_np, forced5b),
                               rtol=0, atol=0)

    # 3) Module forward path on a single (C, H, W) image; a twin module with
    #    the same seed reproduces the sampled rectangle for the reference.
    single = jax.random.normal(jax.random.PRNGKey(2), (C, H, W), jnp.float32)
    single_np = np.asarray(single)
    module_a = RandomErase(4, 4, (0.05, 0.25),
                           (float(np.log(0.5)), float(np.log(2.0))),
                           random_seed=123)
    module_b = RandomErase(4, 4, (0.05, 0.25),
                           (float(np.log(0.5)), float(np.log(2.0))),
                           random_seed=123)
    expected5 = module_b._sample_params(H, W)
    out_single = jax.block_until_ready(module_a(single))
    np.testing.assert_allclose(
        np.asarray(out_single),
        _numpy_reference(single_np[None], expected5[None])[0],
        rtol=0, atol=0)

    # 4) Batched module forward path.
    batch = jax.random.normal(jax.random.PRNGKey(3), (N, C, H, W), jnp.float32)
    batch_np = np.asarray(batch)
    module_c = RandomErase(4, 4, (0.05, 0.25),
                           (float(np.log(0.5)), float(np.log(2.0))),
                           random_seed=7)
    module_d = RandomErase(4, 4, (0.05, 0.25),
                           (float(np.log(0.5)), float(np.log(2.0))),
                           random_seed=7)
    expected_batch = np.stack([module_d._sample_params(H, W) for _ in range(N)])
    out_batch = jax.block_until_ready(module_c(batch))
    np.testing.assert_allclose(np.asarray(out_batch),
                               _numpy_reference(batch_np, expected_batch),
                               rtol=0, atol=0)

    print("KERNEL_OK")
</pallas_src>

<mosaic_0001>
module attributes {stable_mosaic.version = 11 : i64} {
  func.func @_erase_kernel(%arg0: i32, %arg1: memref<6x1xi32, #tpu.memory_space<smem>>, %arg2: memref<1x4x8x16xf32, #tpu.memory_space<vmem>>, %arg3: memref<1x4x8x16xf32, #tpu.memory_space<vmem>>) attributes {dimension_semantics = [#tpu.dimension_semantics<parallel>], iteration_bounds = array<i64: 1>, scalar_prefetch = 1 : i64, scratch_operands = 0 : i64, tpu.core_type = #tpu.core_type<tc>, window_params = [{transform_indices = @transform_0, window_bounds = array<i64: 1, 4, 8, 16>}, {transform_indices = @transform_1, window_bounds = array<i64: 1, 4, 8, 16>}]} {
    %c1 = arith.constant 1 : index
    %0 = arith.index_cast %arg0 : i32 to index
    %1 = memref.load %arg1[%c1, %0] : memref<6x1xi32, #tpu.memory_space<smem>>
    %c8_i32 = arith.constant 8 : i32
    %2 = arith.muli %1, %c8_i32 : i32
    %c2 = arith.constant 2 : index
    %3 = arith.index_cast %arg0 : i32 to index
    %4 = memref.load %arg1[%c2, %3] : memref<6x1xi32, #tpu.memory_space<smem>>
    %c3 = arith.constant 3 : index
    %5 = arith.index_cast %arg0 : i32 to index
    %6 = memref.load %arg1[%c3, %5] : memref<6x1xi32, #tpu.memory_space<smem>>
    %c4 = arith.constant 4 : index
    %7 = arith.index_cast %arg0 : i32 to index
    %8 = memref.load %arg1[%c4, %7] : memref<6x1xi32, #tpu.memory_space<smem>>
    %c5 = arith.constant 5 : index
    %9 = arith.index_cast %arg0 : i32 to index
    %10 = memref.load %arg1[%c5, %9] : memref<6x1xi32, #tpu.memory_space<smem>>
    %c0 = arith.constant 0 : index
    %c0_0 = arith.constant 0 : index
    %c0_1 = arith.constant 0 : index
    %c0_2 = arith.constant 0 : index
    %11 = vector.load %arg2[%c0, %c0_0, %c0_1, %c0_2] : memref<1x4x8x16xf32, #tpu.memory_space<vmem>>, vector<1x4x8x16xf32>
    %12 = tpu.iota {dimensions = array<i32: 2>} : vector<1x1x8x1xi32>
    %13 = vector.broadcast %2 : i32 to vector<1x1x8x1xi32>
    %14 = arith.addi %13, %12 : vector<1x1x8x1xi32>
    %15 = tpu.iota {dimensions = array<i32: 3>} : vector<1x1x1x16xi32>
    %16 = vector.broadcast %4 : i32 to vector<1x1x8x1xi32>
    %17 = arith.cmpi sge, %14, %16 : vector<1x1x8x1xi32>
    %18 = vector.broadcast %6 : i32 to vector<1x1x8x1xi32>
    %19 = arith.cmpi slt, %14, %18 : vector<1x1x8x1xi32>
    %20 = arith.andi %17, %19 : vector<1x1x8x1xi1>
    %21 = vector.broadcast %8 : i32 to vector<1x1x1x16xi32>
    %22 = arith.cmpi sge, %15, %21 : vector<1x1x1x16xi32>
    %23 = vector.broadcast %10 : i32 to vector<1x1x1x16xi32>
    %24 = arith.cmpi slt, %15, %23 : vector<1x1x1x16xi32>
    %25 = arith.andi %22, %24 : vector<1x1x1x16xi1>
    %26 = vector.broadcast %20 : vector<1x1x8x1xi1> to vector<1x1x8x16xi1>
    %27 = vector.broadcast %25 : vector<1x1x1x16xi1> to vector<1x1x8x16xi1>
    %28 = arith.andi %26, %27 : vector<1x1x8x16xi1>
    %cst = arith.constant 0.000000e+00 : f32
    %29 = vector.shape_cast %28 : vector<1x1x8x16xi1> to vector<1x1x8x16xi1>
    %30 = vector.broadcast %29 : vector<1x1x8x16xi1> to vector<1x4x8x16xi1>
    %31 = vector.broadcast %cst : f32 to vector<1x4x8x16xf32>
    %32 = arith.select %30, %31, %11 : vector<1x4x8x16xi1>, vector<1x4x8x16xf32>
    %c0_3 = arith.constant 0 : index
    %c0_4 = arith.constant 0 : index
    %c0_5 = arith.constant 0 : index
    %c0_6 = arith.constant 0 : index
    %33 = vector.load %arg3[%c0_3, %c0_4, %c0_5, %c0_6] : memref<1x4x8x16xf32, #tpu.memory_space<vmem>>, vector<1x4x8x16xf32>
    tpu.vector_store %arg3[%c0_3, %c0_4, %c0_5, %c0_6], %32 {strides = array<i32>} : memref<1x4x8x16xf32, #tpu.memory_space<vmem>>, vector<1x4x8x16xf32>,
    return
  }
  func.func @transform_0(%arg0: i32, %arg1: memref<6x1xi32, #tpu.memory_space<smem>>) -> (i32, i32, i32, i32) {
    %c0 = arith.constant 0 : index
    %0 = arith.index_cast %arg0 : i32 to index
    %1 = memref.load %arg1[%c0, %0] : memref<6x1xi32, #tpu.memory_space<smem>>
    %c1 = arith.constant 1 : index
    %2 = arith.index_cast %arg0 : i32 to index
    %3 = memref.load %arg1[%c1, %2] : memref<6x1xi32, #tpu.memory_space<smem>>
    %c0_i32 = arith.constant 0 : i32
    %c0_i32_0 = arith.constant 0 : i32
    %c0_i32_1 = arith.constant 0 : i32
    return %1, %c0_i32, %3, %c0_i32_0 : i32, i32, i32, i32
  }
  func.func @transform_1(%arg0: i32, %arg1: memref<6x1xi32, #tpu.memory_space<smem>>) -> (i32, i32, i32, i32) {
    %c0 = arith.constant 0 : index
    %0 = arith.index_cast %arg0 : i32 to index
    %1 = memref.load %arg1[%c0, %0] : memref<6x1xi32, #tpu.memory_space<smem>>
    %c1 = arith.constant 1 : index
    %2 = arith.index_cast %arg0 : i32 to index
    %3 = memref.load %arg1[%c1, %2] : memref<6x1xi32, #tpu.memory_space<smem>>
    %c0_i32 = arith.constant 0 : i32
    %c0_i32_0 = arith.constant 0 : i32
    %c0_i32_1 = arith.constant 0 : i32
    return %1, %c0_i32, %3, %c0_i32_0 : i32, i32, i32, i32
  }
}

</mosaic_0001>

<bundles_post_ra>
// kernel: _pallas_random_erase.1
= control target key start
LH: loop header
LB: loop body
LE: loop exit
PB: predicated region body
PF: predicated region fallthrough
CT: control target
= control target key end

     0   :  { %s292_s0 = inlined_call_operand.vmem [shape: s32[6,1], index: 0, kind: input, shape index: {}]   ;;  %s293_s1 = inlined_call_operand.hbm [shape: f32[2,4,16,16], index: 1, kind: input, shape index: {}, may-alias: {1,2}]   ;;  %s294_s2 = inlined_call_operand.hbm [shape: f32[2,4,16,16], index: 2, kind: output, shape index: {}, may-alias: {1,2}]  }
   0x1   :  { %s7_s11 = sshll.u32 %s292_s0, 4  ;;  %s8_s11 = int_to_ptr.vmem [resolvable:$true] %s7_s11 }
   0x2   :  { %s158_s12 = scalar_lea.vmem %s8_s11, 128  ;;  %p163_p1 = scmp.lt.s32.totalorder %s8_s11, %s8_s11 }
   0x3   :  { %p159_p0 = scmp.ne.s32.totalorder %s8_s11, %s158_s12  ;;  %p164_p2 = scmp.lt.s32.totalorder %s158_s12, %s158_s12 }
   0x5   :  { %p165_p3 = por %p164_p2, %p163_p1 }
   0x7   :  { %p166_p4 = pnand %p165_p3, %p159_p0 }
   0x9   :  { %169 = shalt.err (!%p166_p4)  }
   0xa   :  { %s224_s13 = smov [#allocation3]  }
   0xb   :  { %10 = dma.vmem_to_smem %s8_s11, 128, %s224_s13, [#allocation2] }
   0xc   :  { %218 = dma.done.wait [#allocation2], 128 }
   0xd   :  { %219 = vsyncadd [#allocation2], 4294967168 }
   0xe   :  { %12 = sfence }
   0xf   :  { %13 = vsyncpa [#allocation5], 0 }
  0x10   :  { %14 = vsyncpa [#allocation6], 0  ;;  %s17_s14 = sld [smem:[#allocation3]]  ;;  %s225_s16 = smov [#allocation4]  }
  0x11   :  { %s140_s15 = sld [smem:[#allocation3 + $0x80]]  ;;  %s29_s17 = sshll.u32 %s225_s16, 4  ;;  %s30_s17 = int_to_ptr.vmem [resolvable:$true] %s29_s17 }
  0x12   :  { %s172_s26 = scalar_lea.hbm %s293_s1, 2048 }
  0x16   :  { %s141_s0 = sshll.u32 %s17_s14, 3 }
  0x17   :  { %s26_s18 = sadd.s32 %s141_s0, %s140_s15 }
  0x18   :  { %s142_s19 = sshll.u32 %s26_s18, 7 }
  0x19   :  { %s28_s22 = scalar_lea.hbm %s293_s1, %s142_s19 }
  0x1a   :  { %s170_s23 = scalar_lea.hbm %s28_s22, 512  ;;  %p173_p6 = scmp.lt.u32.totalorder %s28_s22, %s293_s1 }
  0x1b   :  { %p171_p5 = scmp.ne.s32.totalorder %s28_s22, %s170_s23  ;;  %p174_p7 = scmp.lt.u32.totalorder %s172_s26, %s170_s23 }
  0x1c   :  { %p176_p9 = scmp.lt.u32.totalorder %s170_s23, %s28_s22 }
  0x1d   :  { %p175_p8 = por %p174_p7, %p173_p6 }
  0x1f   :  { %p177_p10 = por %p176_p9, %p175_p8 }
  0x21   :  { %p178_p11 = pnand %p177_p10, %p171_p5 }
  0x23   :  { %181 = shalt.err (!%p178_p11)
}
  0x24   :  { %s182_s29 = scalar_lea.vmem %s30_s17, 512  ;;  %p187_p13 = scmp.lt.s32.totalorder %s30_s17, %s30_s17 }
  0x25   :  { %p183_p12 = scmp.ne.s32.totalorder %s30_s17, %s182_s29  ;;  %p188_p0 = scmp.lt.s32.totalorder %s182_s29, %s182_s29 }
  0x27   :  { %p189_p1 = por %p188_p0, %p187_p13 }
  0x29   :  { %p190_p2 = pnand %p189_p1, %p183_p12 }
  0x2b   :  { %193 = shalt.err (!%p190_p2)
}
  0x2c   :  { %s226_s30 = smov 256   ;;  %s227_s3 = smov 128  }
  0x2d   :  { %s228_s4 = smov 8  }
  0x2e   :  { %35 = dma.hbm_to_vmem [thread:$0]  %s28_s22, 512, %s30_s17, [#allocation5], %s226_s30, %s227_s3, %s228_s4  }
  0x2f   :  { %220 = dma.done.wait [#allocation5], 512  }
  0x30   :  { %221 = vsyncadd [#allocation5], 4294966784  ;;  %s143_s1 = sld [smem:[#allocation3 + $0x80]]  ;;  %v74_v0 = vlaneseq  ;;  %v70_v10 = vld [vmem:[#allocation4] sm:$0xff]  ;;  %v71_v11 = vld [vmem:[#allocation4 + $0x8] sm:$0xff]  ;;  %s229_s13 = smov [#allocation7]  }
  0x31   :  { %s145_s5 = sld [smem:[#allocation3 + $0x100]]  ;;  %s120_s14 = sshll.u32 %s229_s13, 4  ;;  %v72_v12 = vld [vmem:[#allocation4 + $0x10] sm:$0xff]  ;;  %v73_v13 = vld [vmem:[#allocation4 + $0x18] sm:$0xff]  ;;  %vm101_vm6 = vcmask 130048   ;;  %s271_s14 = int_to_ptr.vmem [resolvable:$true] %s120_s14 }
  0x32   :  { %s146_s6 = sld [smem:[#allocation3 + $0x180]]  ;;  %v75_v1 = vshrl.u32 %v74_v0, 7  ;;  %v79_v2 = vand.u32 127, %v74_v0  ;;  %s194_s18 = scalar_lea.vmem %s271_s14, 512 }
  0x33   :  { %s147_s7 = sld [smem:[#allocation3 + $0x200]]  ;;  %p195_p3 = scmp.ne.s32.totalorder %s271_s14, %s194_s18 }
  0x34   :  { %s148_s8 = sld [smem:[#allocation3 + $0x280]]  ;;  %p199_p4 = scmp.lt.s32.totalorder %s271_s14, %s271_s14 }
  0x35   :  { %s108_s9 = sld [smem:[#allocation3]]  ;;  %p200_p5 = scmp.lt.s32.totalorder %s194_s18, %s194_s18 }
  0x36   :  { %s144_s10 = sshll.u32 %s143_s1, 3 }
  0x37   :  { %v76_v3 = vstv %s144_s10  ;;  %v80_v4 = vstv %s145_s5  ;;  %p201_p6 = por %p200_p5, %p199_p4 }
  0x38   :  { %v82_v5 = vstv %s146_s6  ;;  %v77_v7 = vadd.s32 %v76_v3, %v75_v1 }
  0x39   :  { %v85_v6 = vstv %s147_s7  ;;  %p202_p7 = pnand %p201_p6, %p195_p3 }
  0x3a   :  { %vm260_vm0 = vcmp.ge.s32.totalorder %v79_v2, %v85_v6  ;;  %v87_v9 = vstv %s148_s8  ;;  %vm81_vm2 = vcmp.ge.s32.totalorder %v77_v7, %v80_v4  ;;  %vm83_vm3 = vcmp.lt.s32.totalorder %v77_v7, %v82_v5 }
  0x3b   :  { %s150_s11 = sshll.u32 %s108_s9, 3  ;;  %vm88_vm1 = vcmp.lt.s32.totalorder %v79_v2, %v87_v9  ;;  %vm84_vm5 = vmand %vm81_vm2, %vm83_vm3 }
  0x3c   :  { %s117_s12 = sadd.s32 %s150_s11, %s143_s1  ;;  %vm89_vm4 = vmand %vm260_vm0, %vm88_vm1 }
  0x3d   :  { %s151_s15 = sshll.u32 %s117_s12, 7  ;;  %vm94_vm7 = vmand %vm84_vm5, %vm89_vm4 }
  0x3e   :  { %s269_s0 = scalar_lea.hbm %s294_s2, %s151_s15  ;;  %v97_v14 = vsel %vm94_vm7, 0.0, %v70_v10  ;;  %v98_v15 = vsel %vm94_vm7, 0.0, %v71_v11  ;;  %v99_v16 = vsel %vm94_vm7, 0.0, %v72_v12  ;;  %v100_v17 = vsel %vm94_vm7, 0.0, %v73_v13 }
  0x3f   :  { %102 = vst.msk [vmem:[#allocation7] sm:$0xff] %vm101_vm6, %v97_v14  ;;  %103 = vst.msk [vmem:[#allocation7 + $0x8] sm:$0xff] %vm101_vm6, %v98_v15 }
  0x40   :  { %104 = vst.msk [vmem:[#allocation7 + $0x10] sm:$0xff] %vm101_vm6, %v99_v16  ;;  %105 = vst.msk [vmem:[#allocation7 + $0x18] sm:$0xff] %vm101_vm6, %v100_v17 }
  0x41   :  { %205 = shalt.err (!%p202_p7)
}
  0x42   :  { %s206_s19 = scalar_lea.hbm %s269_s0, 512  ;;  %s208_s22 = scalar_lea.hbm %s294_s2, 2048 }
  0x43   :  { %p207_p8 = scmp.ne.s32.totalorder %s269_s0, %s206_s19  ;;  %p209_p9 = scmp.lt.u32.totalorder %s269_s0, %s294_s2 }
  0x44   :  { %p210_p10 = scmp.lt.u32.totalorder %s208_s22, %s206_s19  ;;  %p212_p12 = scmp.lt.u32.totalorder %s206_s19, %s269_s0 }
  0x46   :  { %p211_p11 = por %p210_p10, %p209_p9 }
  0x48   :  { %p213_p13 = por %p212_p12, %p211_p11 }
  0x4a   :  { %p214_p0 = pnand %p213_p13, %p207_p8 }
  0x4c   :  { %217 = shalt.err (!%p214_p0)
}
  0x4d   :  { %126 = dma.vmem_to_hbm [thread:$0]  %s271_s14, 512, %s269_s0, [#allocation6], %s227_s3, %s226_s30, %s228_s4  }
  0x4e   :  { %222 = dma.done.wait [#allocation6], 512  }
  0x4f   :  { %223 = vsyncadd [#allocation6], 4294966784 }
  0x50   :  { %130 = vsyncpa [#allocation5], 1 }
  0x51   :  { %131 = vsyncpa [#allocation6], 1 }

</bundles_post_ra>
